<compile_context>
chip_gen: v6e
topology: v6e:2x2x1
jax: 0.10.0
libtpu: 0.0.40
codegen_flags: <defaults>
</compile_context>

<pallas_src>
import jax
import jax.numpy as jnp
from jax import lax
from jax.experimental import pallas as pl
from jax.experimental.pallas import tpu as pltpu


def _round_up(x, m):
    return (x + m - 1) // m * m


def _vmem_budget():
    """Generation-aware VMEM budget (7/8 of physical; 56 MiB fallback)."""
    try:
        cap = int(pltpu.get_tpu_info().vmem_capacity_bytes)
    except Exception:
        cap = 64 << 20
    return cap * 7 // 8


def _row_tiling(n, num_relations):
    """Pick (n_pad, tm): n_pad multiple of 128 (lane-dense adjacency), tm a
    multiple of 16 dividing n_pad, >= 2 tiles, adjacency tile within VMEM."""
    n_pad = _round_up(max(n, 128), 128)
    rn = num_relations * n_pad
    budget = _vmem_budget()
    tm = max(16, min(512, n_pad // 2))           # >= 2 tiles for megacore
    while tm > 16 and (n_pad % tm or (2 * tm * rn * 2 + (4 << 20)) > budget):
        tm -= 16
    return n_pad, tm


# ----------------------------------------------------------------------------
# RGCN layer kernel.  Relations folded into the contraction axis:
#   out = tanh( A_flat @ hW_flat + x @ W_root + bias )
# where A_flat[i, r*N + j] = A[r, i, j] and hW_flat[r*N + j] = (x @ W[r])[j].
# Grid = (row_tiles,), fully parallel; no accumulator / program_id needed.
# ----------------------------------------------------------------------------
def _rgcn_kernel(a_ref, hw_ref, x_ref, root_ref, bias_ref, out_ref):
    msg = jnp.dot(a_ref[...], hw_ref[...], preferred_element_type=jnp.float32)
    self_loop = jnp.dot(x_ref[...], root_ref[...],
                        preferred_element_type=jnp.float32)
    out_ref[...] = jnp.tanh(msg + self_loop + bias_ref[...])


def rgcn_layer(adj_flat, w_rel, x, w_root, bias, tm):
    """adj_flat:(Np, R*Np) bf16, x:(Np,Din) f32, w_rel:(R,Din,Dout),
    w_root:(Din,Dout), bias:(1,Dout) -> (Np,Dout) f32."""
    n_pad, rn = adj_flat.shape
    d_in = x.shape[1]
    d_out = w_root.shape[1]
    assert n_pad % tm == 0 and tm % 16 == 0
    num_tiles = n_pad // tm

    # hW[r] = x @ W_rel[r]: tiny (R,N,Din)x(Din,Dout) work done once in XLA,
    # flattened so the kernel body is one long-K matmul per row tile.
    hw_flat = jnp.einsum("nd,rdo->rno", x, w_rel).reshape(rn, d_out)
    hw_flat = hw_flat.astype(jnp.bfloat16)

    x_b = x.astype(jnp.bfloat16)
    root_b = w_root.astype(jnp.bfloat16)
    bias_f = bias.astype(jnp.float32)

    # VMEM estimate: double-buffered adjacency tiles dominate.
    est = (2 * tm * rn * 2            # adjacency tiles (bf16, double-buffered)
           + 2 * rn * d_out * 2       # hW (constant index, still buffered)
           + 2 * tm * d_in * 2        # x row tiles
           + 2 * (d_in * d_out * 2 + d_out * 4)
           + 2 * tm * d_out * 4       # output tiles
           + (1 << 20))
    ckw = dict(dimension_semantics=("parallel",))
    if est > (16 << 20):              # v5e scoped-VMEM default is 16 MiB
        ckw["vmem_limit_bytes"] = int(min(est, _vmem_budget()))

    return pl.pallas_call(
        _rgcn_kernel,
        out_shape=jax.ShapeDtypeStruct((n_pad, d_out), jnp.float32),
        grid=(num_tiles,),
        in_specs=[
            pl.BlockSpec((tm, rn), lambda i: (i, 0)),
            pl.BlockSpec((rn, d_out), lambda i: (0, 0)),
            pl.BlockSpec((tm, d_in), lambda i: (i, 0)),
            pl.BlockSpec((d_in, d_out), lambda i: (0, 0)),
            pl.BlockSpec((1, d_out), lambda i: (0, 0)),
        ],
        out_specs=pl.BlockSpec((tm, d_out), lambda i: (i, 0)),
        compiler_params=pltpu.CompilerParams(**ckw),
    )(adj_flat, hw_flat, x_b, root_b, bias_f)


# ----------------------------------------------------------------------------
# Temporal self-attention layer (head_num = 1, attn_drop = 0.0).
# Batch-tiled grid; fused QKV projection; reproduces the reference exactly,
# including the causal tril mask with (-2^32 + 1) padding and softmax over
# dim=1 (the query axis).
# ----------------------------------------------------------------------------
def _tsal_kernel(x_ref, wqkv_ref, out_ref):
    bt, T, D = x_ref.shape
    x2 = x_ref[...].reshape(bt * T, D)
    qkv = jnp.dot(x2, wqkv_ref[...], preferred_element_type=jnp.float32)
    q = qkv[:, :D].reshape(bt, T, D)
    k = qkv[:, D:2 * D].reshape(bt, T, D)
    v = qkv[:, 2 * D:].reshape(bt, T, D)

    scores = jnp.einsum("btd,bsd->bts", q, k,
                        preferred_element_type=jnp.float32)
    scores = scores * (1.0 / float(T) ** 0.5)

    row = lax.broadcasted_iota(jnp.int32, (T, T), 0)
    col = lax.broadcasted_iota(jnp.int32, (T, T), 1)
    tril = (row >= col)[None, :, :]               # torch.tril(ones) != 0
    scores = jnp.where(tril, scores, jnp.float32(-2.0 ** 32 + 1))

    # F.softmax(output_tensor, 1): normalize over the *query* axis (axis 1).
    m = jnp.max(scores, axis=1, keepdims=True)
    e = jnp.exp(scores - m)
    attn = e / jnp.sum(e, axis=1, keepdims=True)

    out_ref[...] = jnp.einsum("bts,bsd->btd", attn, v,
                              preferred_element_type=jnp.float32)


def temporal_self_attention(x, wq, wk, wv, block_b=8):
    B, T, D = x.shape
    bt = min(block_b, B)
    b_pad = _round_up(B, bt)
    if b_pad != B:
        x = jnp.pad(x, ((0, b_pad - B), (0, 0), (0, 0)))
    wqkv = jnp.concatenate([wq, wk, wv], axis=1).astype(jnp.bfloat16)
    out = pl.pallas_call(
        _tsal_kernel,
        out_shape=jax.ShapeDtypeStruct((b_pad, T, D), jnp.float32),
        grid=(b_pad // bt,),
        in_specs=[
            pl.BlockSpec((bt, T, D), lambda i: (i, 0, 0)),
            pl.BlockSpec((D, 3 * D), lambda i: (0, 0)),
        ],
        out_specs=pl.BlockSpec((bt, T, D), lambda i: (i, 0, 0)),
        compiler_params=pltpu.CompilerParams(
            dimension_semantics=("parallel",)),
    )(x.astype(jnp.bfloat16), wqkv)
    return out[:B]


# ----------------------------------------------------------------------------
# Prediction head (training branch, for_pred=False):
#   res = baddbmm(pe_b, pe_w, user[:, :, None]).squeeze()
#       + sum_t item_embs @ pe_w^T
# Rewritten as ((user + sum_t item_t) . pe_w[b,p]) + pe_b via a batched MXU
# einsum; P is padded to a multiple of 128 for lane-dense stores.
# ----------------------------------------------------------------------------
def _predict_kernel(w_ref, b_ref, user_ref, item_ref, out_ref):
    it_sum = jnp.sum(item_ref[...], axis=1)          # (B, D)
    s = (user_ref[...] + it_sum)[:, None, :]         # (B, 1, D)
    scores = jnp.einsum("bqd,bpd->bqp", s, w_ref[...],
                        preferred_element_type=jnp.float32)   # (B, 1, P)
    out_ref[...] = scores[:, 0, :] + b_ref[...]


def predict_scores(pe_w, pe_b, user_emb, item_embs):
    B, P, D = pe_w.shape
    p_pad = _round_up(P, 128)
    if p_pad != P:
        pe_w = jnp.pad(pe_w, ((0, 0), (0, p_pad - P), (0, 0)))
        pe_b = jnp.pad(pe_b, ((0, 0), (0, p_pad - P)))
    out = pl.pallas_call(
        _predict_kernel,
        out_shape=jax.ShapeDtypeStruct((B, p_pad), jnp.float32),
    )(pe_w, pe_b, user_emb, item_embs)
    return out[:, :P]


# ----------------------------------------------------------------------------
# Glue: parameter init, dense adjacency construction, full forward pass.
# ----------------------------------------------------------------------------
def build_flat_adj(edge_index, edge_type, num_nodes, num_relations):
    """Dense normalized adjacency, flattened to (N, R*N) bf16 so that the
    per-relation sum folds into a single matmul contraction."""
    src = edge_index[0]
    dst = edge_index[1]
    a = jnp.zeros((num_relations, num_nodes, num_nodes), jnp.float32)
    a = a.at[edge_type, dst, src].add(1.0)            # message src -> dst
    deg = jnp.clip(jnp.sum(a, axis=2, keepdims=True), 1.0, None)
    a = a / deg                                        # mean aggregation
    a = jnp.transpose(a, (1, 0, 2)).reshape(num_nodes, num_relations * num_nodes)
    return a.astype(jnp.bfloat16)


def init_params(key, item_num, node_num, relation_num, dim, conv_layer_num,
                num_bases):
    tsal_dim = 2 * conv_layer_num * dim
    keys = iter(jax.random.split(key, 8 + 8 * conv_layer_num))

    def nxt():
        return next(keys)

    # Embedding tables (padding_idx=0 row zeroed).
    pe_w = jax.random.normal(nxt(), (item_num, tsal_dim), jnp.float32) / tsal_dim
    pe_w = pe_w.at[0].set(0.0)
    pe_b = jnp.zeros((item_num, 1), jnp.float32)
    node_emb = jax.random.normal(nxt(), (node_num, dim), jnp.float32) / dim
    node_emb = node_emb.at[0].set(0.0)

    def make_conv_layer():
        return dict(
            basis=jax.random.normal(nxt(), (num_bases, dim, dim), jnp.float32)
            * (1.0 / dim ** 0.5),
            comp=jax.random.normal(nxt(), (relation_num, num_bases), jnp.float32)
            * (1.0 / num_bases ** 0.5),
            root=jax.random.normal(nxt(), (dim, dim), jnp.float32)
            * (1.0 / dim ** 0.5),
            bias=jnp.zeros((1, dim), jnp.float32),
        )

    conv_layers = [make_conv_layer() for _ in range(conv_layer_num)]
    short_conv_layers = [make_conv_layer() for _ in range(conv_layer_num)]

    # Xavier-uniform attention weights.
    limit = (6.0 / (tsal_dim + tsal_dim)) ** 0.5
    wq = jax.random.uniform(nxt(), (tsal_dim, tsal_dim), jnp.float32, -limit, limit)
    wk = jax.random.uniform(nxt(), (tsal_dim, tsal_dim), jnp.float32, -limit, limit)
    wv = jax.random.uniform(nxt(), (tsal_dim, tsal_dim), jnp.float32, -limit, limit)

    return dict(
        predict_emb_w=pe_w, predict_emb_b=pe_b, node_emb=node_emb,
        conv_layers=conv_layers, short_conv_layers=short_conv_layers,
        wq=wq, wk=wk, wv=wv,
    )


def gnn_sr_net_forward(params, X_user_item, X_graph_base, num_relations):
    batch_users, batch_sequences, items_to_predict = X_user_item
    edge_index, edge_type, node_no, short_term_part = X_graph_base

    x = params["node_emb"][node_no]                 # (N, dim)  embedding lookup
    n = x.shape[0]
    n_pad, tm = _row_tiling(n, num_relations)
    if n_pad != n:
        x = jnp.pad(x, ((0, n_pad - n), (0, 0)))    # padded rows stay inert

    adj_flat = build_flat_adj(edge_index, edge_type, n_pad, num_relations)
    # Hoisted: build each short-term adjacency ONCE, reuse across layers.
    short_adj_flats = [
        build_flat_adj(sei, setyp, n_pad, num_relations)
        for (sei, setyp) in short_term_part
    ]

    concat_states = []
    for layer in params["conv_layers"]:
        w_rel = jnp.einsum("rb,bio->rio", layer["comp"], layer["basis"])
        x = rgcn_layer(adj_flat, w_rel, x, layer["root"], layer["bias"], tm)
        concat_states.append(x)

    for layer in params["short_conv_layers"]:
        w_rel = jnp.einsum("rb,bio->rio", layer["comp"], layer["basis"])
        for adj_s in short_adj_flats:
            x = rgcn_layer(adj_s, w_rel, x, layer["root"], layer["bias"], tm)
        concat_states.append(x)

    concat_states = jnp.concatenate(concat_states, axis=1)[:n]  # (N, 2*L*dim)

    user_emb = concat_states[batch_users]            # (bz, 2*L*dim)
    item_embs_conv = concat_states[batch_sequences]  # (bz, T, 2*L*dim)
    item_embs = temporal_self_attention(
        item_embs_conv, params["wq"], params["wk"], params["wv"]
    )

    pe_w = params["predict_emb_w"][items_to_predict]          # (bz, P, 2*L*dim)
    pe_b = params["predict_emb_b"][items_to_predict][..., 0]  # (bz, P)

    res = predict_scores(pe_w, pe_b, user_emb, item_embs)     # (bz, P)
    return res, user_emb, item_embs_conv


if __name__ == "__main__":
    # Small, deterministic synthetic problem.
    dim = 16
    conv_layer_num = 2
    num_bases = 2
    relation_num = 3
    item_num = 40
    node_num = 24
    bz = 2
    seq_len = 8            # T
    H = 3                  # items_to_predict = (bz, 2*H)
    num_edges = 40

    key = jax.random.PRNGKey(0)
    k_param, k_ei, k_et, k_sei, k_set, k_u, k_s, k_p = jax.random.split(key, 8)

    params = init_params(k_param, item_num, node_num, relation_num, dim,
                         conv_layer_num, num_bases)

    node_no = jnp.arange(node_num, dtype=jnp.int32)
    edge_index = jax.random.randint(k_ei, (2, num_edges), 0, node_num, jnp.int32)
    edge_type = jax.random.randint(k_et, (num_edges,), 0, relation_num, jnp.int32)

    short_term_part = []
    sei_keys = jax.random.split(k_sei, 2)
    set_keys = jax.random.split(k_set, 2)
    for i in range(2):
        sei = jax.random.randint(sei_keys[i], (2, 16), 0, node_num, jnp.int32)
        setyp = jax.random.randint(set_keys[i], (16,), 0, relation_num, jnp.int32)
        short_term_part.append((sei, setyp))

    batch_users = jax.random.randint(k_u, (bz,), 1, node_num, jnp.int32)
    batch_sequences = jax.random.randint(k_s, (bz, seq_len), 1, node_num, jnp.int32)
    items_to_predict = jax.random.randint(k_p, (bz, 2 * H), 1, item_num, jnp.int32)

    X_user_item = (batch_users, batch_sequences, items_to_predict)
    X_graph_base = (edge_index, edge_type, node_no, short_term_part)

    res, user_emb, item_embs_conv = gnn_sr_net_forward(
        params, X_user_item, X_graph_base, relation_num
    )
    jax.block_until_ready((res, user_emb, item_embs_conv))

    assert res.shape == (bz, 2 * H)
    assert user_emb.shape == (bz, 2 * conv_layer_num * dim)
    assert item_embs_conv.shape == (bz, seq_len, 2 * conv_layer_num * dim)
    assert bool(jnp.all(jnp.isfinite(res)))
    print("KERNEL_OK")
</pallas_src>

<mosaic_0001>
module attributes {stable_mosaic.version = 11 : i64} {
  func.func @_rgcn_kernel(%arg0: i32, %arg1: memref<64x384xbf16, #tpu.memory_space<vmem>>, %arg2: memref<384x16xbf16, #tpu.memory_space<vmem>>, %arg3: memref<64x16xbf16, #tpu.memory_space<vmem>>, %arg4: memref<16x16xbf16, #tpu.memory_space<vmem>>, %arg5: memref<1x16xf32, #tpu.memory_space<vmem>>, %arg6: memref<64x16xf32, #tpu.memory_space<vmem>>) attributes {dimension_semantics = [#tpu.dimension_semantics<parallel>], iteration_bounds = array<i64: 2>, scalar_prefetch = 0 : i64, scratch_operands = 0 : i64, tpu.core_type = #tpu.core_type<tc>, window_params = [{transform_indices = @transform_0, window_bounds = array<i64: 64, 384>}, {pipeline_mode = #tpu.pipeline_mode<synchronous>, transform_indices = @transform_1, window_bounds = array<i64: 384, 16>}, {transform_indices = @transform_2, window_bounds = array<i64: 64, 16>}, {pipeline_mode = #tpu.pipeline_mode<synchronous>, transform_indices = @transform_3, window_bounds = array<i64: 16, 16>}, {pipeline_mode = #tpu.pipeline_mode<synchronous>, transform_indices = @transform_4, window_bounds = array<i64: 1, 16>}, {transform_indices = @transform_5, window_bounds = array<i64: 64, 16>}]} {
    %c0 = arith.constant 0 : index
    %c0_0 = arith.constant 0 : index
    %0 = vector.load %arg1[%c0, %c0_0] : memref<64x384xbf16, #tpu.memory_space<vmem>>, vector<64x384xbf16>
    %c0_1 = arith.constant 0 : index
    %c0_2 = arith.constant 0 : index
    %1 = vector.load %arg2[%c0_1, %c0_2] : memref<384x16xbf16, #tpu.memory_space<vmem>>, vector<384x16xbf16>
    %cst = arith.constant dense<0.000000e+00> : vector<64x16xf32>
    %2 = tpu.matmul %0, %1, %cst {dimension_numbers = #tpu.dot_dimension_numbers<[1], [0], [0], [1], [0, 0, 1, 1], [], []>} : vector<64x384xbf16>, vector<384x16xbf16>, vector<64x16xf32> -> vector<64x16xf32>
    %c0_3 = arith.constant 0 : index
    %c0_4 = arith.constant 0 : index
    %3 = vector.load %arg3[%c0_3, %c0_4] : memref<64x16xbf16, #tpu.memory_space<vmem>>, vector<64x16xbf16>
    %c0_5 = arith.constant 0 : index
    %c0_6 = arith.constant 0 : index
    %4 = vector.load %arg4[%c0_5, %c0_6] : memref<16x16xbf16, #tpu.memory_space<vmem>>, vector<16x16xbf16>
    %cst_7 = arith.constant dense<0.000000e+00> : vector<64x16xf32>
    %5 = tpu.matmul %3, %4, %cst_7 {dimension_numbers = #tpu.dot_dimension_numbers<[1], [0], [0], [1], [0, 0, 1, 1], [], []>} : vector<64x16xbf16>, vector<16x16xbf16>, vector<64x16xf32> -> vector<64x16xf32>
    %6 = arith.addf %2, %5 : vector<64x16xf32>
    %c0_8 = arith.constant 0 : index
    %c0_9 = arith.constant 0 : index
    %7 = vector.load %arg5[%c0_8, %c0_9] : memref<1x16xf32, #tpu.memory_space<vmem>>, vector<1x16xf32>
    %8 = vector.broadcast %7 : vector<1x16xf32> to vector<64x16xf32>
    %9 = arith.addf %6, %8 : vector<64x16xf32>
    %10 = math.tanh %9 : vector<64x16xf32>
    %c0_10 = arith.constant 0 : index
    %c0_11 = arith.constant 0 : index
    %11 = vector.load %arg6[%c0_10, %c0_11] : memref<64x16xf32, #tpu.memory_space<vmem>>, vector<64x16xf32>
    tpu.vector_store %arg6[%c0_10, %c0_11], %10 {strides = array<i32>} : memref<64x16xf32, #tpu.memory_space<vmem>>, vector<64x16xf32>,
    return
  }
  func.func @transform_0(%arg0: i32) -> (i32, i32) {
    %c0_i32 = arith.constant 0 : i32
    %c0_i32_0 = arith.constant 0 : i32
    return %arg0, %c0_i32 : i32, i32
  }
  func.func @transform_1(%arg0: i32) -> (i32, i32) {
    %c0_i32 = arith.constant 0 : i32
    %c0_i32_0 = arith.constant 0 : i32
    %c0_i32_1 = arith.constant 0 : i32
    return %c0_i32, %c0_i32_0 : i32, i32
  }
  func.func @transform_2(%arg0: i32) -> (i32, i32) {
    %c0_i32 = arith.constant 0 : i32
    %c0_i32_0 = arith.constant 0 : i32
    return %arg0, %c0_i32 : i32, i32
  }
  func.func @transform_3(%arg0: i32) -> (i32, i32) {
    %c0_i32 = arith.constant 0 : i32
    %c0_i32_0 = arith.constant 0 : i32
    %c0_i32_1 = arith.constant 0 : i32
    return %c0_i32, %c0_i32_0 : i32, i32
  }
  func.func @transform_4(%arg0: i32) -> (i32, i32) {
    %c0_i32 = arith.constant 0 : i32
    %c0_i32_0 = arith.constant 0 : i32
    %c0_i32_1 = arith.constant 0 : i32
    return %c0_i32, %c0_i32_0 : i32, i32
  }
  func.func @transform_5(%arg0: i32) -> (i32, i32) {
    %c0_i32 = arith.constant 0 : i32
    %c0_i32_0 = arith.constant 0 : i32
    return %arg0, %c0_i32 : i32, i32
  }
}

</mosaic_0001>

<bundles_post_ra>
// kernel: tpu_custom_call.1
= control target key start
LH: loop header
LB: loop body
LE: loop exit
PB: predicated region body
PF: predicated region fallthrough
CT: control target
= control target key end

     0   :  { %s1127_s18 = smov 0   ;;  %s1285_s0 = inlined_call_operand.vmem [shape: bf16[128,384], index: 0, kind: input, shape index: {}]   ;;  %s1286_s1 = inlined_call_operand.vmem [shape: bf16[384,16], index: 1, kind: input, shape index: {}]   ;;  %s1287_s2 = inlined_call_operand.vmem [shape: bf16[128,16], index: 2, kind: input, shape index: {}]   ;;  %s1288_s3 = inlined_call_operand.vmem [shape: bf16[16,16], index: 3, kind: input, shape index: {}]   ;;  %s1289_s4 = inlined_call_operand.vmem [shape: f32[1,16], index: 4, kind: input, shape index: {}]   ;;  %s1290_s5 = inlined_call_operand.vmem [shape: f32[128,16], index: 5, kind: output, shape index: {}]  }
   0x1 LB: > { %s869_s19 = sadd.s32 4294967295, %s1095_s18   ;;  %p873_p0 = scmp.ge.s32.totalorder %s1095_s18, 1  ;;  %s1095_s18 = sphi %s1127_s18, %s15_s18  }
   0x2   : > { %p200_p1 = scmp.lt.s32.totalorder %s1095_s18, 3 }
   0x4   : > { %p201_p2 = pnand %p873_p0, %p200_p1 }
   0x5   : > { %s874_s22 = sshll.u32 (!%p201_p2), %s869_s19, 3 }
   0x6   : > { %204 = sbr.rel (%p201_p2) target bundleno = 290 (0x122), region = 40  ;;  %p235_p3 = scmp.lt.s32.totalorder (!%p201_p2), %s874_s22, 15 }
   0xb   : > { %v1028_v0 = vld [vmem:[%s1286_s1 + $0x78] sm:$0xff]   ;;  %v1030_v2 = vld [vmem:[%s1288_s3] sm:$0xff]   ;;  %v1031_v3 = vld [vmem:[%s1286_s1 + $0x70] sm:$0xff]   ;;  %s1292_s22 = smov (!%p235_p3, %s874_s22), 15  ;;  %vm354_vm0 = vcmask 130048  }
   0xc   : > { %v1029_v1 = vld [vmem:[%s1286_s1 + $0x38] sm:$0xff]   ;;  %933 = vmatprep.subr.bf16.mxu1 %v1028_v0  ;;  %985 = vmatprep.subr.bf16.mxu0 %v1030_v2  ;;  %v1032_v4 = vld [vmem:[%s1286_s1 + $0x30] sm:$0xff]   ;;  %s877_s6 = sshll.u32 %s1292_s22, 2  ;;  %v1036_v8 = vld [vmem:[%s1286_s1 + $0x68] sm:$0xff]   ;;  %s1019_s14 = smul.u32 12, %s1292_s22 }
   0xd   : > { %934 = vmatpush3.bf16.msra.mxu1 %v1029_v1  ;;  %986 = vmatpush3.bf16.msra.mxu0 %v1030_v2  ;;  %s1156_s9 = scalar_lea.vmem %s1287_s2, %s877_s6  ;;  %v1034_v5 = vld [vmem:[%s1286_s1 + $0xb8] sm:$0xff]   ;;  %v1037_v9 = vld [vmem:[%s1286_s1 + $0x28] sm:$0xff]   ;;  %v1038_v10 = vld [vmem:[%s1286_s1 + $0xb0] sm:$0xff]   ;;  %s879_s11 = sshll.u32 %s1292_s22, 3 }
   0xe   : > { %935 = vmatprep.subr.bf16.mxu1 %v1031_v3  ;;  %v1033_v6 = vld [vmem:[%s1156_s9] sm:$0xff]   ;;  %995 = vmatprep.subr.bf16.mxu0 %v1034_v5  ;;  %v1035_v7 = vld [vmem:[%s1156_s9 + $0x8] sm:$0xff]   ;;  %v1042_v14 = vld [vmem:[%s1286_s1 + $0x58] sm:$0xff]   ;;  %s1214_s25 = scalar_lea.vmem %s1285_s0, %s1019_s14  ;;  %s1259_s14 = scalar_lea.vmem %s1290_s5, %s879_s11 }
   0xf   : > { %987 = vmatprep.mubr.msk.bf16.mxu0 %vm354_vm0, %v1033_v6  ;;  %v1039_v11 = vld [vmem:[%s1286_s1 + $0x60] sm:$0xff]   ;;  %v1041_v13 = vld [vmem:[%s1286_s1 + $0xa8] sm:$0xff]   ;;  %v1043_v15 = vld [vmem:[%s1286_s1 + $0x18] sm:$0xff]  }
  0x10   : > { %988 = vmatmul.mubr.msk.bf16.vlgmr.msra.gmra.mxu0 %vm354_vm0, %v1035_v7  ;;  %v1040_v12 = vld [vmem:[%s1286_s1 + $0x20] sm:$0xff]   ;;  %v1045_v17 = vld [vmem:[%s1286_s1 + $0x50] sm:$0xff]   ;;  %v1047_v19 = vld [vmem:[%s1286_s1 + $0x98] sm:$0xff]  }
  0x11   : > { %936 = vmatpush3.bf16.msra.mxu1 %v1032_v4  ;;  %996 = vmatpush3.bf16.msra.mxu0 %v1034_v5  ;;  %v1044_v16 = vld [vmem:[%s1286_s1 + $0xa0] sm:$0xff]   ;;  %v1046_v18 = vld [vmem:[%s1286_s1 + $0x10] sm:$0xff]   ;;  %v1048_v20 = vld [vmem:[%s1286_s1 + $0x48] sm:$0xff]  }
  0x12   : > { %937 = vmatprep.subr.bf16.mxu1 %v1036_v8  ;;  %997 = vmatprep.subr.bf16.mxu0 %v1038_v10  ;;  %v1049_v21 = vld [vmem:[%s1286_s1 + $0x8] sm:$0xff]   ;;  %v1050_v22 = vld [vmem:[%s1286_s1 + $0x90] sm:$0xff]   ;;  %v1051_v23 = vld [vmem:[%s1286_s1 + $0x40] sm:$0xff]  }
  0x13   : > { %v1053_v24 = vld [vmem:[%s1156_s9 + $0x10] sm:$0xff]   ;;  %v1054_v25 = vld [vmem:[%s1156_s9 + $0x18] sm:$0xff]   ;;  %v1052_v26 = vld [vmem:[%s1286_s1] sm:$0xff]  }
  0x14   : > { %v1057_v27 = vld [vmem:[%s1214_s25 + $0x4] ss:$12 sps:$4 sm:$0xff]   ;;  %991 = vmatprep.mubr.msk.bf16.mxu0 %vm354_vm0, %v1053_v24  ;;  %v1055_v28 = vld [vmem:[%s1214_s25] ss:$12 sps:$4 sm:$0xff]   ;;  %v1060_v31 = vld [vmem:[%s1214_s25 + $0x8] ss:$12 sps:$4 sm:$0xff]  }
  0x15   : > { %938 = vmatpush3.bf16.msra.mxu1 %v1037_v9  ;;  %998 = vmatpush3.bf16.msra.mxu0 %v1038_v10  ;;  %v1058_v29 = vld [vmem:[%s1286_s1 + $0x88] sm:$0xff]   ;;  %v1059_v30 = vld [vmem:[%s1286_s1 + $0x80] sm:$0xff]   ;;  %v1069_v37 = vld [vmem:[%s1214_s25 + $0x50] ss:$12 sps:$4 sm:$0xff]  }
  0x16   : > { %939 = vmatprep.subr.bf16.mxu1 %v1039_v11  ;;  %999 = vmatprep.subr.bf16.mxu0 %v1041_v13  ;;  %v1061_v32 = vld [vmem:[%s1214_s25 + $0x1c] ss:$12 sps:$4 sm:$0xff]   ;;  %v1063_v33 = vld [vmem:[%s1214_s25 + $0x20] ss:$12 sps:$4 sm:$0xff]   ;;  %v1064_v34 = vld [vmem:[%s1214_s25 + $0x18] ss:$12 sps:$4 sm:$0xff]  }
  0x17   : > { %672 = vmatprep.mubr.bf16.mxu1 %v1057_v27  ;;  %v1068_v35 = vld [vmem:[%s1214_s25 + $0x38] ss:$12 sps:$4 sm:$0xff]   ;;  %v1065_v36 = vld [vmem:[%s1214_s25 + $0x34] ss:$12 sps:$4 sm:$0xff]   ;;  %v1067_v38 = vld [vmem:[%s1214_s25 + $0x30] ss:$12 sps:$4 sm:$0xff]  }
  0x18   : > { %992 = vmatmul.mubr.msk.bf16.gmra.mxu0 %vm354_vm0, %v1054_v25  ;;  %v1070_v39 = vld [vmem:[%s1214_s25 + $0x4c] ss:$12 sps:$4 sm:$0xff]   ;;  %v1072_v40 = vld [vmem:[%s1214_s25 + $0x48] ss:$12 sps:$4 sm:$0xff]   ;;  %v1249_v59 = vld [vmem:[%s1289_s4] ss:$0 sm:$0xff] }
  0x19   : > { %940 = vmatpush3.bf16.msra.mxu1 %v1040_v12  ;;  %1000 = vmatpush3.bf16.msra.mxu0 %v1041_v13 }
  0x1a   : > { %941 = vmatprep.subr.bf16.mxu1 %v1042_v14  ;;  %1001 = vmatprep.subr.bf16.mxu0 %v1044_v16 }
  0x1b   : > { %1011 = vmatprep.mubr.bf16.mxu0 %v1060_v31 }
  0x1d   : > { %942 = vmatpush3.bf16.msra.mxu1 %v1043_v15  ;;  %1002 = vmatpush3.bf16.msra.mxu0 %v1044_v16 }
  0x1e   : > { %943 = vmatprep.subr.bf16.mxu1 %v1045_v17  ;;  %1003 = vmatprep.subr.bf16.mxu0 %v1047_v19 }
  0x21   : > { %944 = vmatpush3.bf16.msra.mxu1 %v1046_v18  ;;  %1004 = vmatpush3.bf16.msra.mxu0 %v1047_v19 }
  0x22   : > { %945 = vmatprep.subr.bf16.mxu1 %v1048_v20  ;;  %1005 = vmatprep.subr.bf16.mxu0 %v1050_v22 }
  0x25   : > { %946 = vmatpush3.bf16.msra.mxu1 %v1049_v21  ;;  %1006 = vmatpush3.bf16.msra.mxu0 %v1050_v22 }
  0x26   : > { %947 = vmatprep.subr.bf16.mxu1 %v1051_v23  ;;  %1007 = vmatprep.subr.bf16.mxu0 %v1058_v29 }
  0x29   : > { %948 = vmatpush3.bf16.msra.mxu1 %v1052_v26  ;;  %1008 = vmatpush3.bf16.msra.mxu0 %v1058_v29 }
  0x2a   : > { %1009 = vmatprep.subr.bf16.mxu0 %v1059_v30 }
  0x2c   : > { %673 = vmatmul.mubr.bf16.vlgmr.msra.gmra.mxu1 %v1055_v28 }
  0x2d   : > { %680 = vmatprep.mubr.bf16.mxu1 %v1061_v32  ;;  %1010 = vmatpush3.bf16.msra.mxu0 %v1059_v30 }
  0x30   : > { %1012 = vmatmul.mubr.bf16.vlgmr.msra.gmra.mxu0 %v1063_v33 }
  0x31   : > { %1015 = vmatprep.mubr.bf16.mxu0 %v1068_v35 }
  0x34   : > { %681 = vmatmul.mubr.bf16.gmra.mxu1 %v1064_v34 }
  0x35   : > { %688 = vmatprep.mubr.bf16.mxu1 %v1065_v36 }
  0x38   : > { %1016 = vmatmul.mubr.bf16.gmra.mxu0 %v1069_v37 }
  0x3c   : > { %689 = vmatmul.mubr.bf16.gmra.mxu1 %v1067_v38 }
  0x3d   : > { %696 = vmatprep.mubr.bf16.mxu1 %v1070_v39 }
  0x44   : > { %697 = vmatmul.mubr.bf16.gmra.mxu1 %v1072_v40 }
  0xd0   : > { %v989_v41 = vpop.f32.mrf.mxu0 }
  0xd2   : > { %v401_v42 = vpop.f32.mrf.mxu0 }
  0xd4   : > { %v990_v43 = vpop.f32.mrf.mxu0 }
  0xd6   : > { %v404_v44 = vpop.f32.mrf.mxu0 }
  0xd8   : > { %v993_v45 = vpop.f32.mrf.mxu0 }
  0xda   : > { %v417_v46 = vpop.f32.mrf.mxu0 }
  0xdc   : > { %v1244_v47 = vpop.f32.mrf.mxu0 }
  0xde   : > { %v420_v50 = vpop.f32.mrf.mxu0 }
  0xec   : > { %v949_v48 = vpop.f32.mrf.mxu1 }
  0xee   : > { %v950_v49 = vpop.f32.mrf.mxu1 }
  0xef   : > { %v951_v51 = vadd.f32 %v950_v49, %v949_v48 }
  0xf0   : > { %v952_v52 = vpop.f32.mrf.mxu1  ;;  %v1013_v54 = vpop.f32.mrf.mxu0 }
  0xf1   : > { %v675_v57 = vadd.f32 %v951_v51, %v401_v42 }
  0xf2   : > { %v953_v53 = vpop.f32.mrf.mxu1  ;;  %v739_v58 = vpop.f32.mrf.mxu0 }
  0xf3   : > { %v954_v55 = vadd.f32 %v953_v53, %v952_v52  ;;  %v740_v60 = vadd.f32 %v739_v58, %v675_v57 }
  0xf4   : > { %v955_v56 = vpop.f32.mrf.mxu1  ;;  %v1014_v63 = vpop.f32.mrf.mxu0 }
  0xf5   : > { %v777_v0 = vadd.f32 %v1249_v59, %v740_v60  ;;  %v678_v2 = vadd.f32 %v954_v55, %v404_v44 }
  0xf6   : > { %v956_v61 = vpop.f32.mrf.mxu1  ;;  %v742_v4 = vpop.f32.mrf.mxu0 }
  0xf7   : > { %v957_v62 = vadd.f32 %v956_v61, %v955_v56  ;;  %1073 = vtanh.f32 %v777_v0  ;;  %v743_v5 = vadd.f32 %v742_v4, %v678_v2 }
  0xf8   : > { %v958_v1 = vpop.f32.mrf.mxu1  ;;  %v1017_v9 = vpop.f32.mrf.mxu0 }
  0xf9   : > { %v683_v3 = vadd.f32 %v989_v41, %v957_v62  ;;  %v778_v10 = vadd.f32 %v1249_v59, %v743_v5 }
  0xfa   : > { %v959_v6 = vpop.f32.mrf.mxu1  ;;  %v755_v14 = vpop.f32.mrf.mxu0 }
  0xfb   : > { %v748_v7 = vadd.f32 %v1013_v54, %v683_v3  ;;  %v960_v8 = vadd.f32 %v959_v6, %v958_v1  ;;  %1075 = vtanh.f32 %v778_v10 }
  0xfc   : > { %v961_v11 = vpop.f32.mrf.mxu1  ;;  %v1018_v19 = vpop.f32.mrf.mxu0 }
  0xfd   : > { %v779_v12 = vadd.f32 %v1249_v59, %v748_v7  ;;  %v686_v13 = vadd.f32 %v990_v43, %v960_v8 }
  0xfe   : > { %v962_v15 = vpop.f32.mrf.mxu1  ;;  %v758_v26 = vpop.f32.mrf.mxu0 }
  0xff   : > { %1077 = vtanh.f32 %v779_v12  ;;  %v751_v16 = vadd.f32 %v1014_v63, %v686_v13  ;;  %v963_v17 = vadd.f32 %v962_v15, %v961_v11 }
 0x100   : > { %v964_v18 = vpop.f32.mrf.mxu1 }
 0x101   : > { %v780_v20 = vadd.f32 %v1249_v59, %v751_v16  ;;  %v691_v21 = vadd.f32 %v963_v17, %v417_v46 }
 0x102   : > { %v965_v22 = vpop.f32.mrf.mxu1 }
 0x103   : > { %1079 = vtanh.f32 %v780_v20  ;;  %v966_v23 = vadd.f32 %v965_v22, %v964_v18  ;;  %v756_v24 = vadd.f32 %v755_v14, %v691_v21 }
 0x104   : > { %v967_v25 = vpop.f32.mrf.mxu1  ;;  %v1074_v30 = vpop.eup %1073 }
 0x105   : > { %v781_v27 = vadd.f32 %v1249_v59, %v756_v24  ;;  %v694_v28 = vadd.f32 %v966_v23, %v420_v50  ;;  %793 = vst.msk [vmem:[%s1259_s14] sm:$0xff] %vm354_vm0, %v1074_v30 }
 0x106   : > { %v968_v29 = vpop.f32.mrf.mxu1 }
 0x107   : > { %1081 = vtanh.f32 %v781_v27  ;;  %v969_v31 = vadd.f32 %v968_v29, %v967_v25  ;;  %v759_v32 = vadd.f32 %v758_v26, %v694_v28 }
 0x108   : > { %v970_v33 = vpop.f32.mrf.mxu1  ;;  %v1076_v37 = vpop.eup %1075 }
 0x109   : > { %v699_v34 = vadd.f32 %v993_v45, %v969_v31  ;;  %v782_v35 = vadd.f32 %v1249_v59, %v759_v32  ;;  %794 = vst.msk [vmem:[%s1259_s14 + $0x8] sm:$0xff] %vm354_vm0, %v1076_v37 }
 0x10a   : > { %v971_v36 = vpop.f32.mrf.mxu1 }
 0x10b   : > { %v764_v38 = vadd.f32 %v1017_v9, %v699_v34  ;;  %1083 = vtanh.f32 %v782_v35  ;;  %v972_v39 = vadd.f32 %v971_v36, %v970_v33 }
 0x10c   : > { %v1078_v40 = vpop.eup %1077 }
 0x10d   : > { %795 = vst.msk [vmem:[%s1259_s14 + $0x10] sm:$0xff] %vm354_vm0, %v1078_v40  ;;  %v783_v41 = vadd.f32 %v1249_v59, %v764_v38  ;;  %v702_v42 = vadd.f32 %v1244_v47, %v972_v39 }
 0x10f   : > { %1085 = vtanh.f32 %v783_v41  ;;  %v767_v43 = vadd.f32 %v1018_v19, %v702_v42 }
 0x110   : > { %v1080_v44 = vpop.eup %1079 }
 0x111   : > { %796 = vst.msk [vmem:[%s1259_s14 + $0x18] sm:$0xff] %vm354_vm0, %v1080_v44  ;;  %v784_v45 = vadd.f32 %v1249_v59, %v767_v43 }
 0x113   : > { %1087 = vtanh.f32 %v784_v45 }
 0x114   : > { %v1082_v46 = vpop.eup %1081 }
 0x115   : > { %797 = vst.msk [vmem:[%s1259_s14 + $0x20] sm:$0xff] %vm354_vm0, %v1082_v46 }
 0x118   : > { %v1084_v48 = vpop.eup %1083 }
 0x119   : > { %798 = vst.msk [vmem:[%s1259_s14 + $0x28] sm:$0xff] %vm354_vm0, %v1084_v48 }
 0x11c   : > { %v1086_v49 = vpop.eup %1085 }
 0x11d   : > { %799 = vst.msk [vmem:[%s1259_s14 + $0x30] sm:$0xff] %vm354_vm0, %v1086_v49 }
 0x120   : > { %v1088_v50 = vpop.eup %1087 }
 0x121   : > { %800 = vst.msk [vmem:[%s1259_s14 + $0x38] sm:$0xff] %vm354_vm0, %v1088_v50 }
 0x122 PF: > { %s15_s18 = sadd.s32 1, %s1095_s18  }
 0x123   : > { %p12_p4 = scmp.ge.s32.totalorder %s15_s18, 4  }
 0x125   :  { %14 = sbr.rel (!%p12_p4) target bundleno = 1 (0x1), region = 73 }

</bundles_post_ra>
